<compile_context>
chip_gen: v5e
topology: v5e:2x2
jax: 0.10.0
libtpu: 0.0.40
codegen_flags: <defaults>
</compile_context>

<pallas_src>
import jax
import jax.numpy as jnp
from jax.experimental import pallas as pl
from jax.experimental.pallas import tpu as pltpu

IN_DIM = 28 * 28          # 784 (true input features)
IN_PAD = 896              # 7 * 128  (lane-aligned K for layer 1)
H1 = 256
H2 = 64
H2_PAD = 128              # lane-aligned hidden 2


def _round_up(x, m):
    return ((x + m - 1) // m) * m


def _leaky_relu(x, slope=0.2):
    return jnp.where(x > 0, x, slope * x)


def encoder_kernel(x_ref, w1_ref, b1_ref, w2_ref, b2_ref, w3_ref, b3_ref, o_ref):
    # Layer 1: (TB, 896) @ (896, 256) + (1, 256) -> LeakyReLU(0.2)
    h = jnp.dot(x_ref[...], w1_ref[...], preferred_element_type=jnp.float32)
    h = _leaky_relu(h + b1_ref[...])
    # Layer 2: (TB, 256) @ (256, 128) + (1, 128) -> LeakyReLU(0.2)
    h = jnp.dot(h.astype(jnp.bfloat16), w2_ref[...],
                preferred_element_type=jnp.float32)
    h = _leaky_relu(h + b2_ref[...])
    # Layer 3: (TB, 128) @ (128, DIM_PAD) + (1, DIM_PAD)  (lane-dense store)
    o = jnp.dot(h.astype(jnp.bfloat16), w3_ref[...],
                preferred_element_type=jnp.float32)
    o_ref[...] = (o + b3_ref[...]).astype(o_ref.dtype)


def encoder_mnist_forward(x, params, dim, *, tile_b=256):
    """x: (B, 1, 28, 28) float32. Returns (B, dim) float32."""
    w1, b1, w2, b2, w3, b3 = params
    dim_pad = w3.shape[1]
    B = x.shape[0]

    # Flatten (same as torch x.view(-1, 784)), cast to bf16, lane-pad K to 896.
    x2d = x.reshape(B, IN_DIM).astype(jnp.bfloat16)

    # Effective batch tile: big for throughput, shrunk for tiny batches so we
    # don't compute mostly-padding. Keep it a multiple of 16 (bf16 sublanes).
    tile_eff = min(_round_up(tile_b, 16), _round_up(B, 16))
    pad_b = (-B) % tile_eff
    # TODO(synk): for very large B the full-array pad copies the input once in
    # HBM; a ragged last tile would avoid that, but padding keeps blocks exact.
    x2d = jnp.pad(x2d, ((0, pad_b), (0, IN_PAD - IN_DIM)))
    Bp = x2d.shape[0]

    grid = (Bp // tile_eff,)
    out = pl.pallas_call(
        encoder_kernel,
        out_shape=jax.ShapeDtypeStruct((Bp, dim_pad), jnp.float32),
        grid_spec=pltpu.PrefetchScalarGridSpec(
            num_scalar_prefetch=0,
            grid=grid,
            in_specs=[
                pl.BlockSpec((tile_eff, IN_PAD), lambda i: (i, 0)),  # x tile
                pl.BlockSpec((IN_PAD, H1), lambda i: (0, 0)),        # w1
                pl.BlockSpec((1, H1), lambda i: (0, 0)),             # b1
                pl.BlockSpec((H1, H2_PAD), lambda i: (0, 0)),        # w2
                pl.BlockSpec((1, H2_PAD), lambda i: (0, 0)),         # b2
                pl.BlockSpec((H2_PAD, dim_pad), lambda i: (0, 0)),   # w3
                pl.BlockSpec((1, dim_pad), lambda i: (0, 0)),        # b3
            ],
            out_specs=pl.BlockSpec((tile_eff, dim_pad), lambda i: (i, 0)),
        ),
        compiler_params=pltpu.CompilerParams(
            dimension_semantics=("parallel",)),
    )(x2d, w1, b1, w2, b2, w3, b3)

    return out[:B, :dim]


def init_params(dim, key):
    """Xavier-uniform weights (matching nn.init.xavier_uniform_ on the true
    fan-in/fan-out), zero biases (matching bias.data.fill_(0.0)). Weights are
    stored (in, out), zero-padded to lane-aligned shapes, and cast to bf16."""
    dim_pad = _round_up(dim, 128)

    def xavier(key, fan_in, fan_out, pad_in, pad_out):
        bound = jnp.sqrt(6.0 / (fan_in + fan_out))
        w = jax.random.uniform(key, (fan_in, fan_out), jnp.float32,
                               minval=-bound, maxval=bound)
        w = jnp.pad(w, ((0, pad_in - fan_in), (0, pad_out - fan_out)))
        return w.astype(jnp.bfloat16)

    k1, k2, k3 = jax.random.split(key, 3)
    w1 = xavier(k1, IN_DIM, H1, IN_PAD, H1)          # (896, 256)
    b1 = jnp.zeros((1, H1), jnp.float32)
    w2 = xavier(k2, H1, H2, H1, H2_PAD)              # (256, 128)
    b2 = jnp.zeros((1, H2_PAD), jnp.float32)
    w3 = xavier(k3, H2, dim, H2_PAD, dim_pad)        # (128, dim_pad)
    b3 = jnp.zeros((1, dim_pad), jnp.float32)
    return (w1, b1, w2, b2, w3, b3)


def _reference(x, params, dim):
    """Plain-JAX f32 reference matching the PyTorch forward (padded cols/rows
    are zero, so the padded matmuls are mathematically identical)."""
    w1, b1, w2, b2, w3, b3 = params
    B = x.shape[0]
    h = x.reshape(B, IN_DIM).astype(jnp.bfloat16).astype(jnp.float32)
    h = jnp.pad(h, ((0, 0), (0, IN_PAD - IN_DIM)))
    h = jax.nn.leaky_relu(h @ w1.astype(jnp.float32) + b1, 0.2)
    h = jax.nn.leaky_relu(h @ w2.astype(jnp.float32) + b2, 0.2)
    o = h @ w3.astype(jnp.float32) + b3
    return o[:, :dim]


if __name__ == "__main__":
    dim = 32
    batch = 8
    key = jax.random.PRNGKey(0)
    k_x, k_p = jax.random.split(key)

    x = jax.random.normal(k_x, (batch, 1, 28, 28), jnp.float32)
    params = init_params(dim, k_p)

    out = encoder_mnist_forward(x, params, dim)
    out = jax.block_until_ready(out)

    ref = _reference(x, params, dim)
    assert out.shape == (batch, dim), out.shape
    # bf16 inputs / intermediates -> loosened tolerance vs. the f32 reference.
    assert jnp.allclose(out, ref, atol=5e-2, rtol=5e-2), float(
        jnp.max(jnp.abs(out - ref)))

    print("KERNEL_OK")
</pallas_src>

<mosaic_0001>
module attributes {stable_mosaic.version = 11 : i64} {
  func.func @encoder_kernel(%arg0: i32, %arg1: memref<16x896xbf16, #tpu.memory_space<vmem>>, %arg2: memref<896x256xbf16, #tpu.memory_space<vmem>>, %arg3: memref<1x256xf32, #tpu.memory_space<vmem>>, %arg4: memref<256x128xbf16, #tpu.memory_space<vmem>>, %arg5: memref<1x128xf32, #tpu.memory_space<vmem>>, %arg6: memref<128x128xbf16, #tpu.memory_space<vmem>>, %arg7: memref<1x128xf32, #tpu.memory_space<vmem>>, %arg8: memref<16x128xf32, #tpu.memory_space<vmem>>) attributes {dimension_semantics = [#tpu.dimension_semantics<parallel>], iteration_bounds = array<i64: 1>, scalar_prefetch = 0 : i64, scratch_operands = 0 : i64, tpu.core_type = #tpu.core_type<tc>, window_params = [{transform_indices = @transform_0, window_bounds = array<i64: 16, 896>}, {pipeline_mode = #tpu.pipeline_mode<synchronous>, transform_indices = @transform_1, window_bounds = array<i64: 896, 256>}, {pipeline_mode = #tpu.pipeline_mode<synchronous>, transform_indices = @transform_2, window_bounds = array<i64: 1, 256>}, {pipeline_mode = #tpu.pipeline_mode<synchronous>, transform_indices = @transform_3, window_bounds = array<i64: 256, 128>}, {pipeline_mode = #tpu.pipeline_mode<synchronous>, transform_indices = @transform_4, window_bounds = array<i64: 1, 128>}, {pipeline_mode = #tpu.pipeline_mode<synchronous>, transform_indices = @transform_5, window_bounds = array<i64: 128, 128>}, {pipeline_mode = #tpu.pipeline_mode<synchronous>, transform_indices = @transform_6, window_bounds = array<i64: 1, 128>}, {transform_indices = @transform_7, window_bounds = array<i64: 16, 128>}]} {
    %c0 = arith.constant 0 : index
    %c0_0 = arith.constant 0 : index
    %0 = vector.load %arg1[%c0, %c0_0] : memref<16x896xbf16, #tpu.memory_space<vmem>>, vector<16x896xbf16>
    %c0_1 = arith.constant 0 : index
    %c0_2 = arith.constant 0 : index
    %1 = vector.load %arg2[%c0_1, %c0_2] : memref<896x256xbf16, #tpu.memory_space<vmem>>, vector<896x256xbf16>
    %cst = arith.constant dense<0.000000e+00> : vector<16x256xf32>
    %2 = tpu.matmul %0, %1, %cst {dimension_numbers = #tpu.dot_dimension_numbers<[1], [0], [0], [1], [0, 0, 1, 1], [], []>} : vector<16x896xbf16>, vector<896x256xbf16>, vector<16x256xf32> -> vector<16x256xf32>
    %c0_3 = arith.constant 0 : index
    %c0_4 = arith.constant 0 : index
    %3 = vector.load %arg3[%c0_3, %c0_4] : memref<1x256xf32, #tpu.memory_space<vmem>>, vector<1x256xf32>
    %4 = vector.broadcast %3 : vector<1x256xf32> to vector<16x256xf32>
    %5 = arith.addf %2, %4 : vector<16x256xf32>
    %cst_5 = arith.constant 0.000000e+00 : f32
    %6 = vector.broadcast %cst_5 : f32 to vector<16x256xf32>
    %7 = arith.cmpf ogt, %5, %6 : vector<16x256xf32>
    %cst_6 = arith.constant 2.000000e-01 : f32
    %8 = vector.broadcast %cst_6 : f32 to vector<16x256xf32>
    %9 = arith.mulf %8, %5 : vector<16x256xf32>
    %10 = arith.select %7, %5, %9 : vector<16x256xi1>, vector<16x256xf32>
    %11 = arith.truncf %10 : vector<16x256xf32> to vector<16x256xbf16>
    %c0_7 = arith.constant 0 : index
    %c0_8 = arith.constant 0 : index
    %12 = vector.load %arg4[%c0_7, %c0_8] : memref<256x128xbf16, #tpu.memory_space<vmem>>, vector<256x128xbf16>
    %cst_9 = arith.constant dense<0.000000e+00> : vector<16x128xf32>
    %13 = tpu.matmul %11, %12, %cst_9 {dimension_numbers = #tpu.dot_dimension_numbers<[1], [0], [0], [1], [0, 0, 1, 1], [], []>} : vector<16x256xbf16>, vector<256x128xbf16>, vector<16x128xf32> -> vector<16x128xf32>
    %c0_10 = arith.constant 0 : index
    %c0_11 = arith.constant 0 : index
    %14 = vector.load %arg5[%c0_10, %c0_11] : memref<1x128xf32, #tpu.memory_space<vmem>>, vector<1x128xf32>
    %15 = vector.broadcast %14 : vector<1x128xf32> to vector<16x128xf32>
    %16 = arith.addf %13, %15 : vector<16x128xf32>
    %cst_12 = arith.constant 0.000000e+00 : f32
    %17 = vector.broadcast %cst_12 : f32 to vector<16x128xf32>
    %18 = arith.cmpf ogt, %16, %17 : vector<16x128xf32>
    %cst_13 = arith.constant 2.000000e-01 : f32
    %19 = vector.broadcast %cst_13 : f32 to vector<16x128xf32>
    %20 = arith.mulf %19, %16 : vector<16x128xf32>
    %21 = arith.select %18, %16, %20 : vector<16x128xi1>, vector<16x128xf32>
    %22 = arith.truncf %21 : vector<16x128xf32> to vector<16x128xbf16>
    %c0_14 = arith.constant 0 : index
    %c0_15 = arith.constant 0 : index
    %23 = vector.load %arg6[%c0_14, %c0_15] : memref<128x128xbf16, #tpu.memory_space<vmem>>, vector<128x128xbf16>
    %cst_16 = arith.constant dense<0.000000e+00> : vector<16x128xf32>
    %24 = tpu.matmul %22, %23, %cst_16 {dimension_numbers = #tpu.dot_dimension_numbers<[1], [0], [0], [1], [0, 0, 1, 1], [], []>} : vector<16x128xbf16>, vector<128x128xbf16>, vector<16x128xf32> -> vector<16x128xf32>
    %c0_17 = arith.constant 0 : index
    %c0_18 = arith.constant 0 : index
    %25 = vector.load %arg7[%c0_17, %c0_18] : memref<1x128xf32, #tpu.memory_space<vmem>>, vector<1x128xf32>
    %26 = vector.broadcast %25 : vector<1x128xf32> to vector<16x128xf32>
    %27 = arith.addf %24, %26 : vector<16x128xf32>
    %c0_19 = arith.constant 0 : index
    %c0_20 = arith.constant 0 : index
    %28 = vector.load %arg8[%c0_19, %c0_20] : memref<16x128xf32, #tpu.memory_space<vmem>>, vector<16x128xf32>
    tpu.vector_store %arg8[%c0_19, %c0_20], %27 {strides = array<i32>} : memref<16x128xf32, #tpu.memory_space<vmem>>, vector<16x128xf32>,
    return
  }
  func.func @transform_0(%arg0: i32) -> (i32, i32) {
    %c0_i32 = arith.constant 0 : i32
    %c0_i32_0 = arith.constant 0 : i32
    return %arg0, %c0_i32 : i32, i32
  }
  func.func @transform_1(%arg0: i32) -> (i32, i32) {
    %c0_i32 = arith.constant 0 : i32
    %c0_i32_0 = arith.constant 0 : i32
    %c0_i32_1 = arith.constant 0 : i32
    return %c0_i32, %c0_i32_0 : i32, i32
  }
  func.func @transform_2(%arg0: i32) -> (i32, i32) {
    %c0_i32 = arith.constant 0 : i32
    %c0_i32_0 = arith.constant 0 : i32
    %c0_i32_1 = arith.constant 0 : i32
    return %c0_i32, %c0_i32_0 : i32, i32
  }
  func.func @transform_3(%arg0: i32) -> (i32, i32) {
    %c0_i32 = arith.constant 0 : i32
    %c0_i32_0 = arith.constant 0 : i32
    %c0_i32_1 = arith.constant 0 : i32
    return %c0_i32, %c0_i32_0 : i32, i32
  }
  func.func @transform_4(%arg0: i32) -> (i32, i32) {
    %c0_i32 = arith.constant 0 : i32
    %c0_i32_0 = arith.constant 0 : i32
    %c0_i32_1 = arith.constant 0 : i32
    return %c0_i32, %c0_i32_0 : i32, i32
  }
  func.func @transform_5(%arg0: i32) -> (i32, i32) {
    %c0_i32 = arith.constant 0 : i32
    %c0_i32_0 = arith.constant 0 : i32
    %c0_i32_1 = arith.constant 0 : i32
    return %c0_i32, %c0_i32_0 : i32, i32
  }
  func.func @transform_6(%arg0: i32) -> (i32, i32) {
    %c0_i32 = arith.constant 0 : i32
    %c0_i32_0 = arith.constant 0 : i32
    %c0_i32_1 = arith.constant 0 : i32
    return %c0_i32, %c0_i32_0 : i32, i32
  }
  func.func @transform_7(%arg0: i32) -> (i32, i32) {
    %c0_i32 = arith.constant 0 : i32
    %c0_i32_0 = arith.constant 0 : i32
    return %arg0, %c0_i32 : i32, i32
  }
}

</mosaic_0001>

<bundles_post_ra>
// kernel: tpu_custom_call.1
= control target key start
LH: loop header
LB: loop body
LE: loop exit
PB: predicated region body
PF: predicated region fallthrough
CT: control target
= control target key end

     0   :  { %12 = vsyncpa [#allocation3], 0  ;;  %s2302_s0 = inlined_call_operand.hbm [shape: bf16[16,896], index: 0, kind: input, shape index: {}]   ;;  %s2303_s1 = inlined_call_operand.hbm [shape: bf16[896,256], index: 1, kind: input, shape index: {}]   ;;  %s2304_s2 = inlined_call_operand.hbm [shape: f32[1,256], index: 2, kind: input, shape index: {}]   ;;  %s2305_s3 = inlined_call_operand.hbm [shape: bf16[256,128], index: 3, kind: input, shape index: {}]   ;;  %s2306_s4 = inlined_call_operand.vmem [shape: f32[1,128], index: 4, kind: input, shape index: {}]   ;;  %s2307_s5 = inlined_call_operand.hbm [shape: bf16[128,128], index: 5, kind: input, shape index: {}]   ;;  %s2308_s6 = inlined_call_operand.vmem [shape: f32[1,128], index: 6, kind: input, shape index: {}]   ;;  %s2309_s7 = inlined_call_operand.hbm [shape: f32[16,128], index: 7, kind: output, shape index: {}]  }
   0x1   :  { %13 = vsyncpa [#allocation6], 0 }
   0x2   :  { %14 = vsyncpa [#allocation9], 0  ;;  %s33_s26 = sshll.u32 %s2303_s1, 4  ;;  %s34_s26 = int_to_ptr.hbm [resolvable:$true] %s33_s26 }
   0x3   :  { %15 = vsyncpa [#allocation4], 0  ;;  %s2188_s27 = smov [#allocation5]   ;;  %s57_s8 = sshll.u32 %s2305_s3, 4  ;;  %s58_s8 = int_to_ptr.hbm [resolvable:$true] %s57_s8 }
   0x4   :  { %s35_s28 = sshll.u32 %s2188_s27, 4  ;;  %s2189_s9 = smov 128   ;;  %s36_s28 = int_to_ptr.vmem [resolvable:$true] %s35_s28 }
   0x5   :  { %s2190_s10 = smov 8   ;;  %s2191_s11 = smov [#allocation8]  }
   0x6   :  { %41 = dma.hbm_to_vmem [thread:$0]  %s34_s26, 14336, %s36_s28, [#allocation6], %s2189_s9, %s2189_s9, %s2190_s10  }
   0x7   :  { %s59_s12 = sshll.u32 %s2191_s11, 4  ;;  %s2192_s1 = smov 64   ;;  %s60_s12 = int_to_ptr.vmem [resolvable:$true] %s59_s12 }
   0x8   :  { %s2193_s13 = smov 4   ;;  %s20_s16 = sshll.u32 %s2302_s0, 4  ;;  %s21_s16 = int_to_ptr.hbm [resolvable:$true] %s20_s16 }
   0x9   :  { %65 = dma.hbm_to_vmem [thread:$0]  %s58_s8, 2048, %s60_s12, [#allocation9], %s2192_s1, %s2192_s1, %s2193_s13  }
   0xa   :  { %s2194_s17 = smov [#allocation2]   ;;  %s47_s20 = sshll.u32 %s2304_s2, 4  ;;  %s48_s20 = int_to_ptr.hbm [resolvable:$true] %s47_s20 }
   0xb   :  { %s22_s3 = sshll.u32 %s2194_s17, 4  ;;  %s2195_s21 = smov 448   ;;  %s23_s3 = int_to_ptr.vmem [resolvable:$true] %s22_s3 }
   0xc   :  { %s2196_s22 = smov 28   ;;  %s2197_s23 = smov [#allocation7]  }
   0xd   :  { %28 = dma.hbm_to_vmem [thread:$0]  %s21_s16, 896, %s23_s3, [#allocation3], %s2195_s21, %s2195_s21, %s2196_s22  }
   0xe   :  { %s49_s24 = sshll.u32 %s2197_s23, 4  ;;  %s72_s27 = sshll.u32 %s2307_s5, 4  ;;  %s50_s24 = int_to_ptr.vmem [resolvable:$true] %s49_s24  ;;  %s73_s27 = int_to_ptr.hbm [resolvable:$true] %s72_s27 }
   0xf   :  { %52 = dma.hbm_to_vmem [thread:$0]  %s48_s20, 32, %s50_s24, [#allocation6]  }
  0x10   :  { %s2198_s0 = smov [#allocation10]  }
  0x11   :  { %s74_s28 = sshll.u32 %s2198_s0, 4  ;;  %s75_s28 = int_to_ptr.vmem [resolvable:$true] %s74_s28 }
  0x12   :  { %80 = dma.hbm_to_vmem [thread:$0]  %s73_s27, 1024, %s75_s28, [#allocation9], %s2192_s1, %s2192_s1, %s2193_s13  }
  0x13   :  { %2180 = dma.done.wait [#allocation3], 896  }
  0x14   :  { %2181 = vsyncadd [#allocation3], 4294966400 }
  0x15   :  { %2182 = dma.done.wait [#allocation6], 14368  }
  0x16   :  { %2183 = vsyncadd [#allocation6], 4294952928 }
  0x17   :  { %2184 = dma.done.wait [#allocation9], 3072  }
  0x18   :  { %2185 = vsyncadd [#allocation9], 4294964224  ;;  %v1393_v0 = vld [vmem:[#allocation5 + $0x70] sm:$0xf]  ;;  %v1901_v1 = vld [vmem:[#allocation5 + $0x74] sm:$0xf0] }
  0x19   :  { %v1457_v2 = vld [vmem:[#allocation5 + $0xf0] sm:$0xf]  ;;  %v1394_v3 = vor.u32 %v1901_v1, %v1393_v0  ;;  %v1917_v4 = vld [vmem:[#allocation5 + $0xf4] sm:$0xf0]  ;;  %v1385_v9 = vld [vmem:[#allocation5 + $0x60] sm:$0xf] }
  0x1a   :  { %v1521_v5 = vld [vmem:[#allocation5 + $0x170] sm:$0xf]  ;;  %v1933_v6 = vld [vmem:[#allocation5 + $0x174] sm:$0xf0]  ;;  %v1458_v7 = vor.u32 %v1917_v4, %v1457_v2  ;;  %v1899_v10 = vld [vmem:[#allocation5 + $0x64] sm:$0xf0] }
  0x1b   :  { %v1522_v8 = vor.u32 %v1933_v6, %v1521_v5  ;;  %v1449_v11 = vld [vmem:[#allocation5 + $0xe0] sm:$0xf]  ;;  %825 = vmatpush.bf16.msra.mxu0 %v1394_v3  ;;  %v1386_v12 = vor.u32 %v1899_v10, %v1385_v9  ;;  %v1915_v13 = vld [vmem:[#allocation5 + $0xe4] sm:$0xf0]  ;;  %v1585_v18 = vld [vmem:[#allocation5 + $0x1f0] sm:$0xf] }
  0x1c   :  { %v1513_v14 = vld [vmem:[#allocation5 + $0x160] sm:$0xf]  ;;  %v1931_v15 = vld [vmem:[#allocation5 + $0x164] sm:$0xf0]  ;;  %839 = vmatpush.bf16.msra.mxu1 %v1458_v7  ;;  %v1450_v16 = vor.u32 %v1915_v13, %v1449_v11  ;;  %v1949_v19 = vld [vmem:[#allocation5 + $0x1f4] sm:$0xf0] }
  0x1d   :  { %853 = vmatpush.bf16.msra.mxu2 %v1522_v8  ;;  %v1514_v17 = vor.u32 %v1931_v15, %v1513_v14  ;;  %v1377_v20 = vld [vmem:[#allocation5 + $0x50] sm:$0xf]  ;;  %v1586_v21 = vor.u32 %v1949_v19, %v1585_v18  ;;  %v1897_v22 = vld [vmem:[#allocation5 + $0x54] sm:$0xf0]  ;;  %v1577_v27 = vld [vmem:[#allocation5 + $0x1e0] sm:$0xf] }
  0x1e   :  { %v1441_v23 = vld [vmem:[#allocation5 + $0xd0] sm:$0xf]  ;;  %v1913_v24 = vld [vmem:[#allocation5 + $0xd4] sm:$0xf0]  ;;  %v1378_v28 = vor.u32 %v1897_v22, %v1377_v20  ;;  %v1947_v29 = vld [vmem:[#allocation5 + $0x1e4] sm:$0xf0] }
  0x1f   :  { %v1505_v25 = vld [vmem:[#allocation5 + $0x150] sm:$0xf]  ;;  %v1929_v26 = vld [vmem:[#allocation5 + $0x154] sm:$0xf0]  ;;  %826 = vmatpush.bf16.msra.mxu0 %v1386_v12  ;;  %867 = vmatpush.bf16.msra.mxu3 %v1586_v21  ;;  %v1369_v30 = vld [vmem:[#allocation5 + $0x40] sm:$0xf]  ;;  %v1442_v32 = vor.u32 %v1913_v24, %v1441_v23  ;;  %v1578_v34 = vor.u32 %v1947_v29, %v1577_v27 }
  0x20   :  { %v1895_v31 = vld [vmem:[#allocation5 + $0x44] sm:$0xf0]  ;;  %840 = vmatpush.bf16.msra.mxu1 %v1450_v16  ;;  %v1506_v33 = vor.u32 %v1929_v26, %v1505_v25  ;;  %v1433_v35 = vld [vmem:[#allocation5 + $0xc0] sm:$0xf]  ;;  %v1569_v39 = vld [vmem:[#allocation5 + $0x1d0] sm:$0xf] }
  0x21   :  { %854 = vmatpush.bf16.msra.mxu2 %v1514_v17  ;;  %v1911_v36 = vld [vmem:[#allocation5 + $0xc4] sm:$0xf0]  ;;  %v1497_v37 = vld [vmem:[#allocation5 + $0x140] sm:$0xf]  ;;  %v1945_v40 = vld [vmem:[#allocation5 + $0x1d4] sm:$0xf0]  ;;  %v1370_v41 = vor.u32 %v1895_v31, %v1369_v30 }
  0x22   :  { %v1927_v38 = vld [vmem:[#allocation5 + $0x144] sm:$0xf0]  ;;  %v1570_v42 = vor.u32 %v1945_v40, %v1569_v39  ;;  %v1361_v43 = vld [vmem:[#allocation5 + $0x30] sm:$0xf]  ;;  %v1893_v44 = vld [vmem:[#allocation5 + $0x34] sm:$0xf0]  ;;  %v1434_v45 = vor.u32 %v1911_v36, %v1433_v35 }
  0x23   :  { %827 = vmatpush.bf16.msra.mxu0 %v1378_v28  ;;  %868 = vmatpush.bf16.msra.mxu3 %v1578_v34  ;;  %v1498_v46 = vor.u32 %v1927_v38, %v1497_v37  ;;  %v1425_v47 = vld [vmem:[#allocation5 + $0xb0] sm:$0xf]  ;;  %v1561_v48 = vld [vmem:[#allocation5 + $0x1c0] sm:$0xf]  ;;  %v1943_v49 = vld [vmem:[#allocation5 + $0x1c4] sm:$0xf0]  ;;  %v1362_v53 = vor.u32 %v1893_v44, %v1361_v43 }
  0x24   :  { %841 = vmatpush.bf16.msra.mxu1 %v1442_v32  ;;  %v1909_v50 = vld [vmem:[#allocation5 + $0xb4] sm:$0xf0]  ;;  %v1489_v51 = vld [vmem:[#allocation5 + $0x130] sm:$0xf]  ;;  %v1562_v54 = vor.u32 %v1943_v49, %v1561_v48  ;;  %v1353_v55 = vld [vmem:[#allocation5 + $0x20] sm:$0xf] }
  0x25   :  { %855 = vmatpush.bf16.msra.mxu2 %v1506_v33  ;;  %v1925_v52 = vld [vmem:[#allocation5 + $0x134] sm:$0xf0]  ;;  %v1891_v56 = vld [vmem:[#allocation5 + $0x24] sm:$0xf0]  ;;  %v1426_v57 = vor.u32 %v1909_v50, %v1425_v47  ;;  %v1417_v59 = vld [vmem:[#allocation5 + $0xa0] sm:$0xf] }
  0x26   :  { %v1490_v58 = vor.u32 %v1925_v52, %v1489_v51  ;;  %v1553_v60 = vld [vmem:[#allocation5 + $0x1b0] sm:$0xf]  ;;  %v1941_v61 = vld [vmem:[#allocation5 + $0x1b4] sm:$0xf0]  ;;  %v1907_v62 = vld [vmem:[#allocation5 + $0xa4] sm:$0xf0]  ;;  %v1354_v1 = vor.u32 %v1891_v56, %v1353_v55 }
  0x27   :  { %828 = vmatpush.bf16.msra.mxu0 %v1370_v41  ;;  %869 = vmatpush.bf16.msra.mxu3 %v1570_v42  ;;  %v1481_v63 = vld [vmem:[#allocation5 + $0x120] sm:$0xf]  ;;  %v1923_v0 = vld [vmem:[#allocation5 + $0x124] sm:$0xf0]  ;;  %v1554_v2 = vor.u32 %v1941_v61, %v1553_v60  ;;  %v1345_v3 = vld [vmem:[#allocation5 + $0x10] sm:$0xf]  ;;  %v1418_v5 = vor.u32 %v1907_v62, %v1417_v59 }
  0x28   :  { %842 = vmatpush.bf16.msra.mxu1 %v1434_v45  ;;  %v1889_v4 = vld [vmem:[#allocation5 + $0x14] sm:$0xf0]  ;;  %v1482_v6 = vor.u32 %v1923_v0, %v1481_v63  ;;  %v1409_v7 = vld [vmem:[#allocation5 + $0x90] sm:$0xf]  ;;  %v1545_v8 = vld [vmem:[#allocation5 + $0x1a0] sm:$0xf] }
  0x29   :  { %856 = vmatpush.bf16.msra.mxu2 %v1498_v46  ;;  %v1939_v9 = vld [vmem:[#allocation5 + $0x1a4] sm:$0xf0]  ;;  %v1905_v10 = vld [vmem:[#allocation5 + $0x94] sm:$0xf0]  ;;  %v1473_v11 = vld [vmem:[#allocation5 + $0x110] sm:$0xf]  ;;  %v1346_v13 = vor.u32 %v1889_v4, %v1345_v3 }
  0x2a   :  { %v1921_v12 = vld [vmem:[#allocation5 + $0x114] sm:$0xf0]  ;;  %v1546_v14 = vor.u32 %v1939_v9, %v1545_v8  ;;  %v1337_v15 = vld [vmem:[#allocation5] sm:$0xf]  ;;  %v1887_v16 = vld [vmem:[#allocation5 + $0x4] sm:$0xf0]  ;;  %v1410_v18 = vor.u32 %v1905_v10, %v1409_v7 }
  0x2b   :  { %829 = vmatpush.bf16.msra.mxu0 %v1362_v53  ;;  %870 = vmatpush.bf16.msra.mxu3 %v1562_v54  ;;  %v1401_v17 = vld [vmem:[#allocation5 + $0x80] sm:$0xf]  ;;  %v1474_v19 = vor.u32 %v1921_v12, %v1473_v11  ;;  %v1903_v20 = vld [vmem:[#allocation5 + $0x84] sm:$0xf0]  ;;  %v1537_v21 = vld [vmem:[#allocation5 + $0x190] sm:$0xf]  ;;  %v1338_v29 = vor.u32 %v1887_v16, %v1337_v15 }
  0x2c   :  { %843 = vmatpush.bf16.msra.mxu1 %v1426_v57  ;;  %v1937_v22 = vld [vmem:[#allocation5 + $0x194] sm:$0xf0]  ;;  %v1465_v23 = vld [vmem:[#allocation5 + $0x100] sm:$0xf]  ;;  %v1919_v24 = vld [vmem:[#allocation5 + $0x104] sm:$0xf0]  ;;  %v1402_v33 = vor.u32 %v1903_v20, %v1401_v17 }
  0x2d   :  { %857 = vmatpush.bf16.msra.mxu2 %v1490_v58  ;;  %v1649_v25 = vld [vmem:[#allocation5 + $0x270] sm:$0xf]  ;;  %v1965_v26 = vld [vmem:[#allocation5 + $0x274] sm:$0xf0]  ;;  %v1538_v30 = vor.u32 %v1937_v22, %v1537_v21  ;;  %v1466_v34 = vor.u32 %v1919_v24, %v1465_v23  ;;  %v1529_v35 = vld [vmem:[#allocation5 + $0x180] sm:$0xf] }
  0x2e   :  { %v1713_v27 = vld [vmem:[#allocation5 + $0x2f0] sm:$0xf]  ;;  %v1981_v28 = vld [vmem:[#allocation5 + $0x2f4] sm:$0xf0]  ;;  %v1935_v36 = vld [vmem:[#allocation5 + $0x184] sm:$0xf0]  ;;  %v1650_v38 = vor.u32 %v1965_v26, %v1649_v25 }
  0x2f   :  { %830 = vmatpush.bf16.msra.mxu0 %v1354_v1  ;;  %871 = vmatpush.bf16.msra.mxu3 %v1554_v2  ;;  %v1777_v31 = vld [vmem:[#allocation5 + $0x370] sm:$0xf]  ;;  %v1997_v32 = vld [vmem:[#allocation5 + $0x374] sm:$0xf0]  ;;  %v1641_v37 = vld [vmem:[#allocation5 + $0x260] sm:$0xf]  ;;  %v1714_v39 = vor.u32 %v1981_v28, %v1713_v27  ;;  %v1530_v47 = vor.u32 %v1935_v36, %v1529_v35 }
  0x30   :  { %844 = vmatpush.bf16.msra.mxu1 %v1418_v5  ;;  %v1963_v40 = vld [vmem:[#allocation5 + $0x264] sm:$0xf0]  ;;  %v1900_v41 = vld [vmem:[#allocation5 + $0x74] sm:$0xf]  ;;  %v1395_v42 = vld [vmem:[#allocation5 + $0x78] sm:$0xf0]  ;;  %v1778_v43 = vor.u32 %v1997_v32, %v1777_v31 }
  0x31   :  { %858 = vmatpush.bf16.msra.mxu2 %v1482_v6  ;;  %v1705_v44 = vld [vmem:[#allocation5 + $0x2e0] sm:$0xf]  ;;  %v1979_v45 = vld [vmem:[#allocation5 + $0x2e4] sm:$0xf0]  ;;  %v1882_v50 = vld [vmem:[#allocation2 + $0x18] sm:$0xf0]  ;;  %v1398_v51 = vor.u32 %v1900_v41, %v1395_v42  ;;  %v1642_v56 = vor.u32 %v1963_v40, %v1641_v37 }
  0x32   :  { %v1769_v46 = vld [vmem:[#allocation5 + $0x360] sm:$0xf]  ;;  %v1995_v48 = vld [vmem:[#allocation5 + $0x364] sm:$0xf0]  ;;  %v1633_v52 = vld [vmem:[#allocation5 + $0x250] sm:$0xf]  ;;  %v1706_v57 = vor.u32 %v1979_v45, %v1705_v44 }
  0x33   :  { %831 = vmatpush.bf16.msra.mxu0 %v1346_v13  ;;  %872 = vmatpush.bf16.msra.mxu3 %v1546_v14  ;;  %v1309_v49 = vld [vmem:[#allocation2] sm:$0xf]  ;;  %v1317_v54 = vld [vmem:[#allocation2 + $0x8] sm:$0xf]  ;;  %v1883_v55 = vld [vmem:[#allocation2 + $0x20] sm:$0xf0]  ;;  %v1770_v62 = vor.u32 %v1995_v48, %v1769_v46 }
  0x34   :  { %845 = vmatpush.bf16.msra.mxu1 %v1410_v18  ;;  %v2258_v53 = vor.u32 %v1882_v50, %v1309_v49  ;;  %v1961_v58 = vld [vmem:[#allocation5 + $0x254] sm:$0xf0]  ;;  %v1898_v59 = vld [vmem:[#allocation5 + $0x64] sm:$0xf]  ;;  %v1387_v60 = vld [vmem:[#allocation5 + $0x68] sm:$0xf0]  ;;  %v2260_v61 = vor.u32 %v1883_v55, %v1317_v54 }
  0x35   :  { %859 = vmatpush.bf16.msra.mxu2 %v1474_v19  ;;  %v1697_v63 = vld [vmem:[#allocation5 + $0x2d0] sm:$0xf]  ;;  %v1977_v0 = vld [vmem:[#allocation5 + $0x2d4] sm:$0xf0]  ;;  %v1879_v1 = vld [vmem:[#allocation2 + $0x4] sm:$0xf]  ;;  %v1390_v5 = vor.u32 %v1898_v59, %v1387_v60  ;;  %v1634_v9 = vor.u32 %v1961_v58, %v1633_v52 }
  0x36   :  { %v1761_v2 = vld [vmem:[#allocation5 + $0x350] sm:$0xf]  ;;  %v1993_v3 = vld [vmem:[#allocation5 + $0x354] sm:$0xf0]  ;;  %v1311_v4 = vld [vmem:[#allocation2 + $0x1c] sm:$0xf0]  ;;  %v1698_v10 = vor.u32 %v1977_v0, %v1697_v63 }
  0x37   :  { %832 = vmatpush.bf16.msra.mxu0 %v1338_v29  ;;  %873 = vmatpush.bf16.msra.mxu3 %v1538_v30  ;;  %v1625_v6 = vld [vmem:[#allocation5 + $0x240] sm:$0xf]  ;;  %v1959_v7 = vld [vmem:[#allocation5 + $0x244] sm:$0xf0]  ;;  %v2264_v8 = vor.u32 %v1879_v1, %v1311_v4  ;;  %v1896_v12 = vld [vmem:[#allocation5 + $0x54] sm:$0xf]  ;;  %v1762_v14 = vor.u32 %v1993_v3, %v1761_v2 }
  0x38   :  { %846 = vmatpush.bf16.msra.mxu1 %v1402_v33  ;;  %v1689_v11 = vld [vmem:[#allocation5 + $0x2c0] sm:$0xf]  ;;  %v1379_v13 = vld [vmem:[#allocation5 + $0x58] sm:$0xf0]  ;;  %v1975_v15 = vld [vmem:[#allocation5 + $0x2c4] sm:$0xf0]  ;;  %v1626_v22 = vor.u32 %v1959_v7, %v1625_v6 }
  0x39   :  { %860 = vmatpush.bf16.msra.mxu2 %v1466_v34  ;;  %v1880_v16 = vld [vmem:[#allocation2 + $0xc] sm:$0xf]  ;;  %v1319_v17 = vld [vmem:[#allocation2 + $0x24] sm:$0xf0]  ;;  %v1753_v18 = vld [vmem:[#allocation5 + $0x340] sm:$0xf]  ;;  %v1382_v21 = vor.u32 %v1896_v12, %v1379_v13  ;;  %v1690_v23 = vor.u32 %v1975_v15, %v1689_v11 }
  0x3a   :  { %833 = vmatmul.bf16.vlgmr.msra.gmra.mxu0 %v2258_v53  ;;  %v1991_v19 = vld [vmem:[#allocation5 + $0x344] sm:$0xf0]  ;;  %v2267_v20 = vor.u32 %v1880_v16, %v1319_v17  ;;  %v1617_v24 = vld [vmem:[#allocation5 + $0x230] sm:$0xf]  ;;  %v1894_v25 = vld [vmem:[#allocation5 + $0x44] sm:$0xf] }
  0x3b   :  { %881 = vmatpush.bf16.msrb.mxu0 %v1650_v38  ;;  %874 = vmatpush.bf16.msra.mxu3 %v1530_v47  ;;  %v1371_v26 = vld [vmem:[#allocation5 + $0x48] sm:$0xf0]  ;;  %v1754_v27 = vor.u32 %v1991_v19, %v1753_v18  ;;  %v1957_v28 = vld [vmem:[#allocation5 + $0x234] sm:$0xf0]  ;;  %v1681_v29 = vld [vmem:[#allocation5 + $0x2b0] sm:$0xf] }
  0x3c   :  { %895 = vmatpush.bf16.msrb.mxu1 %v1714_v39  ;;  %861 = vmatmul.bf16.vlgmr.msra.gmra.mxu2 %v2260_v61  ;;  %v1973_v30 = vld [vmem:[#allocation5 + $0x2b4] sm:$0xf0]  ;;  %v1745_v31 = vld [vmem:[#allocation5 + $0x330] sm:$0xf]  ;;  %v1374_v33 = vor.u32 %v1894_v25, %v1371_v26  ;;  %v1618_v34 = vor.u32 %v1957_v28, %v1617_v24  ;;  %v1609_v36 = vld [vmem:[#allocation5 + $0x220] sm:$0xf] }
  0x3d   :  { %909 = vmatpush.bf16.msrb.mxu2 %v1778_v43  ;;  %847 = vmatmul.bf16.vlgmr.msra.gmra.mxu1 %v2264_v8  ;;  %v1989_v32 = vld [vmem:[#allocation5 + $0x334] sm:$0xf0]  ;;  %v1682_v35 = vor.u32 %v1973_v30, %v1681_v29  ;;  %v1892_v37 = vld [vmem:[#allocation5 + $0x34] sm:$0xf]  ;;  %v1363_v38 = vld [vmem:[#allocation5 + $0x38] sm:$0xf0] }
  0x3e   :  { %875 = vmatmul.bf16.vlgmr.msra.gmra.mxu3 %v2267_v20  ;;  %v1746_v39 = vor.u32 %v1989_v32, %v1745_v31  ;;  %v1955_v40 = vld [vmem:[#allocation5 + $0x224] sm:$0xf0]  ;;  %v1673_v41 = vld [vmem:[#allocation5 + $0x2a0] sm:$0xf]  ;;  %v1366_v45 = vor.u32 %v1892_v37, %v1363_v38  ;;  %v1601_v48 = vld [vmem:[#allocation5 + $0x210] sm:$0xf] }
  0x3f   :  { %923 = vmatpush.bf16.msrb.mxu3 %v1398_v51  ;;  %882 = vmatpush.bf16.msrb.mxu0 %v1642_v56  ;;  %v1971_v42 = vld [vmem:[#allocation5 + $0x2a4] sm:$0xf0]  ;;  %v1737_v43 = vld [vmem:[#allocation5 + $0x320] sm:$0xf]  ;;  %v1610_v46 = vor.u32 %v1955_v40, %v1609_v36  ;;  %v1890_v49 = vld [vmem:[#allocation5 + $0x24] sm:$0xf] }
  0x40   :  { %896 = vmatpush.bf16.msrb.mxu1 %v1706_v57  ;;  %v1987_v44 = vld [vmem:[#allocation5 + $0x324] sm:$0xf0]  ;;  %v1674_v47 = vor.u32 %v1971_v42, %v1673_v41  ;;  %v1355_v50 = vld [vmem:[#allocation5 + $0x28] sm:$0xf0]  ;;  %v1953_v52 = vld [vmem:[#allocation5 + $0x214] sm:$0xf0] }
  0x41   :  { %910 = vmatpush.bf16.msrb.mxu2 %v1770_v62  ;;  %v1738_v51 = vor.u32 %v1987_v44, %v1737_v43  ;;  %v1665_v54 = vld [vmem:[#allocation5 + $0x290] sm:$0xf]  ;;  %v1969_v55 = vld [vmem:[#allocation5 + $0x294] sm:$0xf0]  ;;  %v1358_v58 = vor.u32 %v1890_v49, %v1355_v50  ;;  %v1593_v59 = vld [vmem:[#allocation5 + $0x200] sm:$0xf]  ;;  %v1602_v0 = vor.u32 %v1953_v52, %v1601_v48 }
  0x42   :  { %v1729_v56 = vld [vmem:[#allocation5 + $0x310] sm:$0xf]  ;;  %v1985_v57 = vld [vmem:[#allocation5 + $0x314] sm:$0xf0]  ;;  %v1951_v60 = vld [vmem:[#allocation5 + $0x204] sm:$0xf0]  ;;  %v1666_v1 = vor.u32 %v1969_v55, %v1665_v54 }
  0x43   :  { %924 = vmatpush.bf16.msrb.mxu3 %v1390_v5  ;;  %883 = vmatpush.bf16.msrb.mxu0 %v1634_v9  ;;  %v1657_v62 = vld [vmem:[#allocation5 + $0x280] sm:$0xf]  ;;  %v1967_v63 = vld [vmem:[#allocation5 + $0x284] sm:$0xf0]  ;;  %v1888_v4 = vld [vmem:[#allocation5 + $0x14] sm:$0xf]  ;;  %v1730_v6 = vor.u32 %v1985_v57, %v1729_v56  ;;  %v1594_v19 = vor.u32 %v1951_v60, %v1593_v59 }
  0x44   :  { %897 = vmatpush.bf16.msrb.mxu1 %v1698_v10  ;;  %v1721_v2 = vld [vmem:[#allocation5 + $0x300] sm:$0xf]  ;;  %v1983_v3 = vld [vmem:[#allocation5 + $0x304] sm:$0xf0]  ;;  %v1347_v5 = vld [vmem:[#allocation5 + $0x18] sm:$0xf0] }
  0x45   :  { %911 = vmatpush.bf16.msrb.mxu2 %v1762_v14  ;;  %v1916_v7 = vld [vmem:[#allocation5 + $0xf4] sm:$0xf]  ;;  %v1459_v9 = vld [vmem:[#allocation5 + $0xf8] sm:$0xf0]  ;;  %v1325_v12 = vld [vmem:[#allocation2 + $0x10] sm:$0xf]  ;;  %v1350_v14 = vor.u32 %v1888_v4, %v1347_v5  ;;  %v1722_v25 = vor.u32 %v1983_v3, %v1721_v2 }
  0x46   :  { %v1932_v10 = vld [vmem:[#allocation5 + $0x174] sm:$0xf]  ;;  %v1523_v11 = vld [vmem:[#allocation5 + $0x178] sm:$0xf0]  ;;  %v1333_v15 = vld [vmem:[#allocation2 + $0x18] sm:$0xf]  ;;  %v1462_v26 = vor.u32 %v1916_v7, %v1459_v9 }
  0x47   :  { %925 = vmatpush.bf16.msrb.mxu3 %v1382_v21  ;;  %884 = vmatpush.bf16.msrb.mxu0 %v1626_v22  ;;  %v1884_v13 = vld [vmem:[#allocation2 + $0x28] sm:$0xf0]  ;;  %v1885_v16 = vld [vmem:[#allocation2 + $0x30] sm:$0xf0]  ;;  %v1658_v21 = vor.u32 %v1967_v63, %v1657_v62  ;;  %v1886_v24 = vld [vmem:[#allocation5 + $0x4] sm:$0xf]  ;;  %v1526_v30 = vor.u32 %v1932_v10, %v1523_v11 }
  0x48   :  { %898 = vmatpush.bf16.msrb.mxu1 %v1690_v23  ;;  %v1948_v17 = vld [vmem:[#allocation5 + $0x1f4] sm:$0xf]  ;;  %v1587_v18 = vld [vmem:[#allocation5 + $0x1f8] sm:$0xf0]  ;;  %v1327_v23 = vld [vmem:[#allocation2 + $0x2c] sm:$0xf0]  ;;  %v2274_v40 = vor.u32 %v1885_v16, %v1333_v15 }
  0x49   :  { %912 = vmatpush.bf16.msrb.mxu2 %v1754_v27  ;;  %v1881_v22 = vld [vmem:[#allocation2 + $0x14] sm:$0xf]  ;;  %v1339_v27 = vld [vmem:[#allocation5 + $0x8] sm:$0xf0]  ;;  %v1914_v28 = vld [vmem:[#allocation5 + $0xe4] sm:$0xf]  ;;  %v1590_v31 = vor.u32 %v1948_v17, %v1587_v18 }
  0x4a   :  { %v1451_v29 = vld [vmem:[#allocation5 + $0xe8] sm:$0xf0]  ;;  %v1930_v32 = vld [vmem:[#allocation5 + $0x164] sm:$0xf]  ;;  %v2272_v36 = vor.u32 %v1881_v22, %v1327_v23  ;;  %v1342_v41 = vor.u32 %v1886_v24, %v1339_v27  ;;  %v1912_v44 = vld [vmem:[#allocation5 + $0xd4] sm:$0xf] }
  0x4b   :  { %926 = vmatpush.bf16.msrb.mxu3 %v1374_v33  ;;  %885 = vmatpush.bf16.msrb.mxu0 %v1618_v34  ;;  %v1964_v33 = vld [vmem:[#allocation5 + $0x274] sm:$0xf]  ;;  %v1651_v34 = vld [vmem:[#allocation5 + $0x278] sm:$0xf0]  ;;  %v1515_v37 = vld [vmem:[#allocation5 + $0x168] sm:$0xf0]  ;;  %v1454_v42 = vor.u32 %v1914_v28, %v1451_v29 }
  0x4c   :  { %899 = vmatpush.bf16.msrb.mxu1 %v1682_v35  ;;  %v2270_v35 = vor.u32 %v1884_v13, %v1325_v12  ;;  %v1946_v38 = vld [vmem:[#allocation5 + $0x1e4] sm:$0xf]  ;;  %v1654_v43 = vor.u32 %v1964_v33, %v1651_v34  ;;  %v1928_v48 = vld [vmem:[#allocation5 + $0x154] sm:$0xf]  ;;  %v1643_v50 = vld [vmem:[#allocation5 + $0x268] sm:$0xf0] }
  0x4d   :  { %913 = vmatpush.bf16.msrb.mxu2 %v1746_v39  ;;  %v1579_v39 = vld [vmem:[#allocation5 + $0x1e8] sm:$0xf0]  ;;  %v1962_v49 = vld [vmem:[#allocation5 + $0x264] sm:$0xf]  ;;  %v1944_v52 = vld [vmem:[#allocation5 + $0x1d4] sm:$0xf] }
  0x4e   :  { %v1571_v54 = vld [vmem:[#allocation5 + $0x1d8] sm:$0xf0]  ;;  %v1646_v56 = vor.u32 %v1962_v49, %v1643_v50  ;;  %v1910_v57 = vld [vmem:[#allocation5 + $0xc4] sm:$0xf]  ;;  %v1960_v63 = vld [vmem:[#allocation5 + $0x254] sm:$0xf] }
  0x4f   :  { %927 = vmatpush.bf16.msrb.mxu3 %v1366_v45  ;;  %886 = vmatpush.bf16.msrb.mxu0 %v1610_v46  ;;  %v1443_v45 = vld [vmem:[#allocation5 + $0xd8] sm:$0xf0]  ;;  %v1518_v46 = vor.u32 %v1930_v32, %v1515_v37  ;;  %v1574_v60 = vor.u32 %v1944_v52, %v1571_v54  ;;  %v1926_v62 = vld [vmem:[#allocation5 + $0x144] sm:$0xf]  ;;  %v1563_v3 = vld [vmem:[#allocation5 + $0x1c8] sm:$0xf0] }
  0x50   :  { %900 = vmatpush.bf16.msrb.mxu1 %v1674_v47  ;;  %v1582_v47 = vor.u32 %v1946_v38, %v1579_v39  ;;  %v1446_v55 = vor.u32 %v1912_v44, %v1443_v45  ;;  %v1942_v2 = vld [vmem:[#allocation5 + $0x1c4] sm:$0xf]  ;;  %v1427_v7 = vld [vmem:[#allocation5 + $0xb8] sm:$0xf0]  ;;  %v1924_v11 = vld [vmem:[#allocation5 + $0x134] sm:$0xf] }
  0x51   :  { %914 = vmatpush.bf16.msrb.mxu2 %v1738_v51  ;;  %v1507_v51 = vld [vmem:[#allocation5 + $0x158] sm:$0xf0]  ;;  %v1566_v10 = vor.u32 %v1942_v2, %v1563_v3  ;;  %v1958_v12 = vld [vmem:[#allocation5 + $0x244] sm:$0xf]  ;;  %v1627_v13 = vld [vmem:[#allocation5 + $0x248] sm:$0xf0] }
  0x52   :  { %v1510_v59 = vor.u32 %v1928_v48, %v1507_v51  ;;  %v1940_v15 = vld [vmem:[#allocation5 + $0x1b4] sm:$0xf]  ;;  %v1555_v16 = vld [vmem:[#allocation5 + $0x1b8] sm:$0xf0]  ;;  %v1906_v17 = vld [vmem:[#allocation5 + $0xa4] sm:$0xf]  ;;  %v1630_v18 = vor.u32 %v1958_v12, %v1627_v13 }
  0x53   :  { %928 = vmatpush.bf16.msrb.mxu3 %v1358_v58  ;;  %887 = vmatpush.bf16.msrb.mxu0 %v1602_v0  ;;  %v1435_v58 = vld [vmem:[#allocation5 + $0xc8] sm:$0xf0]  ;;  %v1635_v0 = vld [vmem:[#allocation5 + $0x258] sm:$0xf0]  ;;  %v1956_v22 = vld [vmem:[#allocation5 + $0x234] sm:$0xf]  ;;  %v1558_v24 = vor.u32 %v1940_v15, %v1555_v16 }
  0x54   :  { %901 = vmatpush.bf16.msrb.mxu1 %v1666_v1  ;;  %v1499_v1 = vld [vmem:[#allocation5 + $0x148] sm:$0xf0]  ;;  %v1438_v4 = vor.u32 %v1910_v57, %v1435_v58  ;;  %v1638_v5 = vor.u32 %v1960_v63, %v1635_v0  ;;  %v1938_v27 = vld [vmem:[#allocation5 + $0x1a4] sm:$0xf]  ;;  %v1411_v32 = vld [vmem:[#allocation5 + $0x98] sm:$0xf0] }
  0x55   :  { %915 = vmatpush.bf16.msrb.mxu2 %v1730_v6  ;;  %v1908_v6 = vld [vmem:[#allocation5 + $0xb4] sm:$0xf]  ;;  %v1502_v9 = vor.u32 %v1926_v62, %v1499_v1  ;;  %v1547_v28 = vld [vmem:[#allocation5 + $0x1a8] sm:$0xf0]  ;;  %v1954_v38 = vld [vmem:[#allocation5 + $0x224] sm:$0xf] }
  0x56   :  { %v1550_v34 = vor.u32 %v1938_v27, %v1547_v28  ;;  %v1920_v37 = vld [vmem:[#allocation5 + $0x114] sm:$0xf]  ;;  %v1611_v39 = vld [vmem:[#allocation5 + $0x228] sm:$0xf0]  ;;  %v1918_v48 = vld [vmem:[#allocation5 + $0x104] sm:$0xf] }
  0x57   :  { %929 = vmatpush.bf16.msrb.mxu3 %v1350_v14  ;;  %888 = vmatpush.bf16.msrb.mxu0 %v1594_v19  ;;  %v1491_v14 = vld [vmem:[#allocation5 + $0x138] sm:$0xf0]  ;;  %v1419_v19 = vld [vmem:[#allocation5 + $0xa8] sm:$0xf0]  ;;  %v1614_v45 = vor.u32 %v1954_v38, %v1611_v39  ;;  %v1952_v52 = vld [vmem:[#allocation5 + $0x214] sm:$0xf] }
  0x58   :  { %902 = vmatpush.bf16.msrb.mxu1 %v1658_v21  ;;  %v1922_v21 = vld [vmem:[#allocation5 + $0x124] sm:$0xf]  ;;  %v1494_v23 = vor.u32 %v1924_v11, %v1491_v14  ;;  %v1422_v29 = vor.u32 %v1906_v17, %v1419_v19  ;;  %v1467_v51 = vld [vmem:[#allocation5 + $0x108] sm:$0xf0]  ;;  %v1603_v54 = vld [vmem:[#allocation5 + $0x218] sm:$0xf0] }
  0x59   :  { %916 = vmatpush.bf16.msrb.mxu2 %v1722_v25  ;;  %v1619_v25 = vld [vmem:[#allocation5 + $0x238] sm:$0xf0]  ;;  %v1996_v57 = vld [vmem:[#allocation5 + $0x374] sm:$0xf]  ;;  %v1606_v63 = vor.u32 %v1952_v52, %v1603_v54  ;;  %v1470_v0 = vor.u32 %v1918_v48, %v1467_v51  ;;  %v1950_v2 = vld [vmem:[#allocation5 + $0x204] sm:$0xf] }
  0x5a   :  { %889 = vmatmul.bf16.vlgmr.msrb.gmra.mxu0 %v2270_v35  ;;  %v1779_v58 = vld [vmem:[#allocation5 + $0x378] sm:$0xf0]  ;;  %v1595_v3 = vld [vmem:[#allocation5 + $0x208] sm:$0xf0]  ;;  %v1976_v14 = vld [vmem:[#allocation5 + $0x2d4] sm:$0xf] }
  0x5b   :  { %937 = vmatpush.bf16.msra.mxu0 %v1462_v26  ;;  %903 = vmatmul.bf16.vlgmr.msrb.gmra.mxu1 %v2272_v36  ;;  %v1483_v26 = vld [vmem:[#allocation5 + $0x128] sm:$0xf0]  ;;  %v1598_v11 = vor.u32 %v1950_v2, %v1595_v3  ;;  %v1699_v15 = vld [vmem:[#allocation5 + $0x2d8] sm:$0xf0]  ;;  %v1992_v16 = vld [vmem:[#allocation5 + $0x354] sm:$0xf] }
  0x5c   :  { %951 = vmatpush.bf16.msra.mxu1 %v1526_v30  ;;  %917 = vmatmul.bf16.vlgmr.msrb.gmra.mxu2 %v2274_v40  ;;  %v1622_v30 = vor.u32 %v1956_v22, %v1619_v25  ;;  %v1486_v33 = vor.u32 %v1922_v21, %v1483_v26  ;;  %v1763_v17 = vld [vmem:[#allocation5 + $0x358] sm:$0xf0]  ;;  %v1974_v19 = vld [vmem:[#allocation5 + $0x2c4] sm:$0xf]  ;;  %v1691_v21 = vld [vmem:[#allocation5 + $0x2c8] sm:$0xf0] }
  0x5d   :  { %965 = vmatpush.bf16.msra.mxu2 %v1590_v31  ;;  %930 = vmatpush.bf16.msrb.mxu3 %v1342_v41  ;;  %v1904_v31 = vld [vmem:[#allocation5 + $0x94] sm:$0xf]  ;;  %v1475_v41 = vld [vmem:[#allocation5 + $0x118] sm:$0xf0]  ;;  %v1990_v22 = vld [vmem:[#allocation5 + $0x344] sm:$0xf] }
  0x5e   :  { %v1414_v44 = vor.u32 %v1904_v31, %v1411_v32  ;;  %v1478_v49 = vor.u32 %v1920_v37, %v1475_v41  ;;  %v1972_v25 = vld [vmem:[#allocation5 + $0x2b4] sm:$0xf]  ;;  %v1683_v26 = vld [vmem:[#allocation5 + $0x2b8] sm:$0xf0]  ;;  %v1986_v31 = vld [vmem:[#allocation5 + $0x324] sm:$0xf] }
  0x5f   :  { %938 = vmatpush.bf16.msra.mxu0 %v1454_v42  ;;  %v1936_v42 = vld [vmem:[#allocation5 + $0x194] sm:$0xf]  ;;  %v1686_v28 = vor.u32 %v1972_v25, %v1683_v26  ;;  %v1739_v32 = vld [vmem:[#allocation5 + $0x328] sm:$0xf0]  ;;  %v1667_v37 = vld [vmem:[#allocation5 + $0x298] sm:$0xf0] }
  0x60   :  { %952 = vmatpush.bf16.msra.mxu1 %v1518_v46  ;;  %931 = vmatmul.bf16.vlgmr.msrb.gmra.mxu3 %v2258_v53  ;;  %v1430_v53 = vor.u32 %v1908_v6, %v1427_v7  ;;  %v1902_v46 = vld [vmem:[#allocation5 + $0x84] sm:$0xf]  ;;  %v1707_v7 = vld [vmem:[#allocation5 + $0x2e8] sm:$0xf0]  ;;  %v1988_v27 = vld [vmem:[#allocation5 + $0x334] sm:$0xf] }
  0x61   :  { %979 = vmatpush.bf16.msra.mxu3 %v1654_v43  ;;  %966 = vmatpush.bf16.msra.mxu2 %v1582_v47  ;;  %v1539_v43 = vld [vmem:[#allocation5 + $0x198] sm:$0xf0]  ;;  %v1403_v47 = vld [vmem:[#allocation5 + $0x88] sm:$0xf0]  ;;  %v1978_v6 = vld [vmem:[#allocation5 + $0x2e4] sm:$0xf] }
  0x62   :  { %v1542_v50 = vor.u32 %v1936_v42, %v1539_v43  ;;  %v1406_v62 = vor.u32 %v1902_v46, %v1403_v47  ;;  %v1710_v12 = vor.u32 %v1978_v6, %v1707_v7  ;;  %v1984_v38 = vld [vmem:[#allocation5 + $0x314] sm:$0xf]  ;;  %v1731_v39 = vld [vmem:[#allocation5 + $0x318] sm:$0xf0]  ;;  %v1966_v43 = vld [vmem:[#allocation5 + $0x284] sm:$0xf] }
  0x63   :  { %939 = vmatpush.bf16.msra.mxu0 %v1446_v55  ;;  %v1980_v55 = vld [vmem:[#allocation5 + $0x2f4] sm:$0xf]  ;;  %v1734_v42 = vor.u32 %v1984_v38, %v1731_v39  ;;  %v1723_v46 = vld [vmem:[#allocation5 + $0x308] sm:$0xf0]  ;;  %v2002_v52 = vld [vmem:[#allocation8 + $0x20] sm:$0xff]  ;;  %s1292_s1 = sshll.u32 %s2309_s7, 4  ;;  %s1293_s1 = int_to_ptr.hbm [resolvable:$true] %s1292_s1 }
  0x64   :  { %953 = vmatpush.bf16.msra.mxu1 %v1510_v59  ;;  %v1934_v59 = vld [vmem:[#allocation5 + $0x184] sm:$0xf]  ;;  %v2003_v51 = vld [vmem:[#allocation8 + $0x28] sm:$0xff]  ;;  %v2001_v54 = vld [vmem:[#allocation8 + $0x18] sm:$0xff] }
  0x65   :  { %980 = vmatpush.bf16.msra.mxu3 %v1646_v56  ;;  %967 = vmatpush.bf16.msra.mxu2 %v1574_v60  ;;  %v1715_v56 = vld [vmem:[#allocation5 + $0x2f8] sm:$0xf0]  ;;  %v1531_v60 = vld [vmem:[#allocation5 + $0x188] sm:$0xf0]  ;;  %v2012_v25 = vld [vmem:[#allocation8 + $0x70] sm:$0xff] }
  0x66   :  { %v1718_v1 = vor.u32 %v1980_v55, %v1715_v56  ;;  %v2000_v55 = vld [vmem:[#allocation8 + $0x10] sm:$0xff] }
  0x67   :  { %940 = vmatpush.bf16.msra.mxu0 %v1438_v4  ;;  %v1782_v4 = vor.u32 %v1996_v57, %v1779_v58  ;;  %v2286_v57 = vld [vmem:[#allocation7] sm:$0x3] }
  0x68   :  { %954 = vmatpush.bf16.msra.mxu1 %v1502_v9  ;;  %v1994_v9 = vld [vmem:[#allocation5 + $0x364] sm:$0xf] }
  0x69   :  { %981 = vmatpush.bf16.msra.mxu3 %v1638_v5  ;;  %968 = vmatpush.bf16.msra.mxu2 %v1566_v10  ;;  %v1534_v5 = vor.u32 %v1934_v59, %v1531_v60  ;;  %v1771_v10 = vld [vmem:[#allocation5 + $0x368] sm:$0xf0] }
  0x6a   :  { %v1774_v13 = vor.u32 %v1994_v9, %v1771_v10  ;;  %v1999_v59 = vld [vmem:[#allocation8 + $0x8] sm:$0xff] }
  0x6b   :  { %941 = vmatpush.bf16.msra.mxu0 %v1430_v53  ;;  %v1702_v53 = vor.u32 %v1976_v14, %v1699_v15 }
  0x6c   :  { %955 = vmatpush.bf16.msra.mxu1 %v1494_v23  ;;  %v1755_v23 = vld [vmem:[#allocation5 + $0x348] sm:$0xf0] }
  0x6d   :  { %982 = vmatpush.bf16.msra.mxu3 %v1630_v18  ;;  %969 = vmatpush.bf16.msra.mxu2 %v1558_v24  ;;  %v1766_v18 = vor.u32 %v1992_v16, %v1763_v17  ;;  %v1694_v24 = vor.u32 %v1974_v19, %v1691_v21 }
  0x6f   :  { %942 = vmatpush.bf16.msra.mxu0 %v1422_v29  ;;  %v1970_v29 = vld [vmem:[#allocation5 + $0x2a4] sm:$0xf] }
  0x70   :  { %956 = vmatpush.bf16.msra.mxu1 %v1486_v33  ;;  %v1742_v33 = vor.u32 %v1986_v31, %v1739_v32  ;;  %v2008_v32 = vld [vmem:[#allocation8 + $0x50] sm:$0xff] }
  0x71   :  { %983 = vmatpush.bf16.msra.mxu3 %v1622_v30  ;;  %970 = vmatpush.bf16.msra.mxu2 %v1550_v34  ;;  %v1675_v30 = vld [vmem:[#allocation5 + $0x2a8] sm:$0xf0]  ;;  %v1968_v34 = vld [vmem:[#allocation5 + $0x294] sm:$0xf] }
  0x72   :  { %v1670_v41 = vor.u32 %v1968_v34, %v1667_v37  ;;  %v2006_v37 = vld [vmem:[#allocation8 + $0x40] sm:$0xff] }
  0x73   :  { %943 = vmatpush.bf16.msra.mxu0 %v1414_v44  ;;  %v1659_v44 = vld [vmem:[#allocation5 + $0x288] sm:$0xf0] }
  0x74   :  { %957 = vmatpush.bf16.msra.mxu1 %v1478_v49  ;;  %v1662_v47 = vor.u32 %v1966_v43, %v1659_v44  ;;  %v2005_v49 = vld [vmem:[#allocation8 + $0x38] sm:$0xff] }
  0x75   :  { %984 = vmatpush.bf16.msra.mxu3 %v1614_v45  ;;  %971 = vmatpush.bf16.msra.mxu2 %v1542_v50  ;;  %v1982_v45 = vld [vmem:[#allocation5 + $0x304] sm:$0xf]  ;;  %v2004_v50 = vld [vmem:[#allocation8 + $0x30] sm:$0xff] }
  0x76   :  { %v1726_v48 = vor.u32 %v1982_v45, %v1723_v46 }
  0x77   :  { %944 = vmatpush.bf16.msra.mxu0 %v1406_v62 }
  0x78   :  { %958 = vmatpush.bf16.msra.mxu1 %v1470_v0 }
  0x79   :  { %985 = vmatpush.bf16.msra.mxu3 %v1606_v63  ;;  %972 = vmatpush.bf16.msra.mxu2 %v1534_v5 }
  0x7a   :  { %945 = vmatmul.bf16.vlgmr.msra.gmra.mxu0 %v2264_v8  ;;  %v1758_v8 = vor.u32 %v1990_v22, %v1755_v23 }
  0x7b   :  { %993 = vmatpush.bf16.msrb.mxu0 %v1718_v1  ;;  %959 = vmatmul.bf16.vlgmr.msra.gmra.mxu1 %v2260_v61  ;;  %v1747_v61 = vld [vmem:[#allocation5 + $0x338] sm:$0xf0] }
  0x7c   :  { %1007 = vmatpush.bf16.msrb.mxu1 %v1782_v4  ;;  %973 = vmatmul.bf16.vlgmr.msra.gmra.mxu2 %v2267_v20  ;;  %v1750_v20 = vor.u32 %v1988_v27, %v1747_v61  ;;  %v2011_v27 = vld [vmem:[#allocation8 + $0x68] sm:$0xff] }
  0x7d   :  { %986 = vmatpush.bf16.msra.mxu3 %v1598_v11  ;;  %1167 = vmatpush.bf16.msrb.mxu2 %v2005_v49 }
  0x7f   :  { %994 = vmatpush.bf16.msrb.mxu0 %v1710_v12 }
  0x80   :  { %1008 = vmatpush.bf16.msrb.mxu1 %v1774_v13  ;;  %987 = vmatmul.bf16.vlgmr.msra.gmra.mxu3 %v2270_v35  ;;  %v1678_v35 = vor.u32 %v1970_v29, %v1675_v30  ;;  %v2010_v29 = vld [vmem:[#allocation8 + $0x60] sm:$0xff]  ;;  %v2009_v30 = vld [vmem:[#allocation8 + $0x58] sm:$0xff] }
  0x81   :  { %1168 = vmatpush.bf16.msrb.mxu2 %v2004_v50 }
  0x83   :  { %995 = vmatpush.bf16.msrb.mxu0 %v1702_v53  ;;  %v2013_v53 = vld [vmem:[#allocation8 + $0x78] sm:$0xff] }
  0x84   :  { %1009 = vmatpush.bf16.msrb.mxu1 %v1766_v18  ;;  %1181 = vmatpush.bf16.msrb.mxu3 %v2013_v53 }
  0x85   :  { %1169 = vmatpush.bf16.msrb.mxu2 %v2003_v51 }
  0x87   :  { %996 = vmatpush.bf16.msrb.mxu0 %v1694_v24 }
  0x88   :  { %1010 = vmatpush.bf16.msrb.mxu1 %v1758_v8  ;;  %1182 = vmatpush.bf16.msrb.mxu3 %v2012_v25 }
  0x89   :  { %1170 = vmatpush.bf16.msrb.mxu2 %v2002_v52 }
  0x8b   :  { %997 = vmatpush.bf16.msrb.mxu0 %v1686_v28 }
  0x8c   :  { %1011 = vmatpush.bf16.msrb.mxu1 %v1750_v20  ;;  %1183 = vmatpush.bf16.msrb.mxu3 %v2011_v27 }
  0x8d   :  { %1171 = vmatpush.bf16.msrb.mxu2 %v2001_v54 }
  0x8f   :  { %998 = vmatpush.bf16.msrb.mxu0 %v1678_v35  ;;  %v2007_v35 = vld [vmem:[#allocation8 + $0x48] sm:$0xff] }
  0x90   :  { %1012 = vmatpush.bf16.msrb.mxu1 %v1742_v33  ;;  %1184 = vmatpush.bf16.msrb.mxu3 %v2010_v29  ;;  %v226_v33 = vperm.slane %v2286_v57, 1 }
  0x91   :  { %1172 = vmatpush.bf16.msrb.mxu2 %v2000_v55 }
  0x93   :  { %999 = vmatpush.bf16.msrb.mxu0 %v1670_v41 }
  0x94   :  { %1013 = vmatpush.bf16.msrb.mxu1 %v1734_v42  ;;  %1185 = vmatpush.bf16.msrb.mxu3 %v2009_v30 }
  0x95   :  { %1173 = vmatpush.bf16.msrb.mxu2 %v1999_v59 }
  0x97   :  { %1000 = vmatpush.bf16.msrb.mxu0 %v1662_v47 }
  0x98   :  { %1014 = vmatpush.bf16.msrb.mxu1 %v1726_v48  ;;  %1186 = vmatpush.bf16.msrb.mxu3 %v2008_v32 }
  0x9a   :  { %1001 = vmatmul.bf16.vlgmr.msrb.gmra.mxu0 %v2272_v36  ;;  %v225_v36 = vperm.slane %v2286_v57, 0 }
  0x9b   :  { %1015 = vmatmul.bf16.vlgmr.msrb.gmra.mxu1 %v2274_v40  ;;  %v1998_v40 = vld [vmem:[#allocation8] sm:$0xff] }
  0x9c   :  { %1174 = vmatpush.bf16.msrb.mxu2 %v1998_v40  ;;  %1187 = vmatpush.bf16.msrb.mxu3 %v2007_v35 }
  0xa0   :  { %1188 = vmatpush.bf16.msrb.mxu3 %v2006_v37 }
  0xb7   :  { %v834_v56 = vpop.f32.mrf.mxu0 }
  0xb8   :  { %v835_v62 = vadd.f32 %v834_v56, %v225_v36 }
  0xba   :  { %v848_v58 = vpop.f32.mrf.mxu1 }
  0xbb   :  { %v849_v1 = vadd.f32 %v848_v58, %v835_v62 }
  0xbf   :  { %v862_v60 = vpop.f32.mrf.mxu2  ;;  %v836_v63 = vpop.f32.mrf.mxu0 }
  0xc0   :  { %v863_v3 = vadd.f32 %v862_v60, %v849_v1  ;;  %v837_v4 = vadd.f32 %v836_v63, %v225_v36 }
  0xc1   :  { %v876_v2 = vpop.f32.mrf.mxu3 }
  0xc2   :  { %v850_v0 = vpop.f32.mrf.mxu1  ;;  %v877_v7 = vadd.f32 %v876_v2, %v863_v3 }
  0xc3   :  { %v851_v6 = vadd.f32 %v850_v0, %v837_v4 }
  0xc7   :  { %v864_v5 = vpop.f32.mrf.mxu2 }
  0xc8   :  { %v865_v11 = vadd.f32 %v864_v5, %v851_v6  ;;  %v2021_v6 = vld [vmem:[#allocation10 + $0x38] sm:$0xff] }
  0xc9   :  { %v878_v13 = vpop.f32.mrf.mxu3  ;;  %1270 = vmatpush.bf16.msra.mxu0 %v2021_v6 }
  0xca   :  { %v879_v16 = vadd.f32 %v878_v13, %v865_v11  ;;  %v2017_v11 = vld [vmem:[#allocation10 + $0x18] sm:$0xff]  ;;  %v2015_v13 = vld [vmem:[#allocation10 + $0x8] sm:$0xff] }
  0xd7   :  { %v890_v9 = vpop.f32.mrf.mxu0 }
  0xd8   :  { %v904_v10 = vpop.f32.mrf.mxu1  ;;  %v891_v12 = vadd.f32 %v890_v9, %v877_v7  ;;  %v2020_v7 = vld [vmem:[#allocation10 + $0x30] sm:$0xff]  ;;  %v2019_v9 = vld [vmem:[#allocation10 + $0x28] sm:$0xff] }
  0xd9   :  { %1271 = vmatpush.bf16.msra.mxu0 %v2020_v7 }
  0xda   :  { %v905_v15 = vadd.f32 %v904_v10, %v891_v12  ;;  %v2018_v10 = vld [vmem:[#allocation10 + $0x20] sm:$0xff]  ;;  %v2016_v12 = vld [vmem:[#allocation10 + $0x10] sm:$0xff] }
  0xdd   :  { %1272 = vmatpush.bf16.msra.mxu0 %v2019_v9 }
  0xdf   :  { %v918_v14 = vpop.f32.mrf.mxu2  ;;  %v892_v17 = vpop.f32.mrf.mxu0 }
  0xe0   :  { %v893_v18 = vadd.f32 %v892_v17, %v879_v16  ;;  %v906_v19 = vpop.f32.mrf.mxu1  ;;  %v919_v21 = vadd.f32 %v918_v14, %v905_v15  ;;  %v2014_v14 = vld [vmem:[#allocation10] sm:$0xff] }
  0xe1   :  { %1273 = vmatpush.bf16.msra.mxu0 %v2018_v10  ;;  %v2034_v16 = vld [vmem:[%s2306_s4] ss:$0 sm:$0xff]  ;;  %s2199_s4 = smov [#allocation11]  }
  0xe2   :  { %v907_v22 = vadd.f32 %v906_v19, %v893_v18  ;;  %v1025_v24 = vmul.f32 0.2, %v919_v21  ;;  %vm1021_vm0 = vcmp.gt.f32.partialorder %v919_v21, 0.0  ;;  %s1290_s8 = sshll.u32 %s2199_s4, 4  ;;  %s1291_s8 = int_to_ptr.vmem [resolvable:$true] %s1290_s8 }
  0xe3   :  { %v932_v31 = vpop.f32.mrf.mxu3 }
  0xe4   :  { %v1029_v61 = vsel %vm1021_vm0, %v919_v21, %v1025_v24  ;;  %v933_v41 = vadd.f32 %v932_v31, %v226_v33 }
  0xe5   :  { %1274 = vmatpush.bf16.msra.mxu0 %v2017_v11 }
  0xe7   :  { %v920_v23 = vpop.f32.mrf.mxu2 }
  0xe8   :  { %v921_v8 = vadd.f32 %v920_v23, %v907_v22 }
  0xe9   :  { %1275 = vmatpush.bf16.msra.mxu0 %v2016_v12 }
  0xea   :  { %vm1023_vm1 = vcmp.gt.f32.partialorder %v921_v8, 0.0  ;;  %v1027_v26 = vmul.f32 0.2, %v921_v8 }
  0xeb   :  { %v934_v39 = vpop.f32.mrf.mxu3 }
  0xec   :  { %v1031_v28 = vsel %vm1023_vm1, %v921_v8, %v1027_v26  ;;  %v935_v44 = vadd.f32 %v934_v39, %v226_v33 }
  0xed   :  { %v1033_v20 = vpack.c.bf16 %v1031_v28, %v1029_v61  ;;  %1276 = vmatpush.bf16.msra.mxu0 %v2015_v13  ;;  %v2035_v61 = vld [vmem:[%s2308_s6] ss:$0 sm:$0xff] }
  0xef   :  { %1175 = vmatmul.bf16.vlgmr.msrb.gmra.mxu2 %v1033_v20 }
  0xf1   :  { %1277 = vmatpush.bf16.msra.mxu0 %v2014_v14 }
  0xf7   :  { %v946_v34 = vpop.f32.mrf.mxu0 }
  0xf8   :  { %v960_v38 = vpop.f32.mrf.mxu1  ;;  %v947_v42 = vadd.f32 %v946_v34, %v933_v41 }
  0xfa   :  { %v961_v46 = vadd.f32 %v960_v38, %v947_v42 }
  0xff   :  { %v974_v43 = vpop.f32.mrf.mxu2  ;;  %v948_v45 = vpop.f32.mrf.mxu0 }
 0x100   :  { %v962_v47 = vpop.f32.mrf.mxu1  ;;  %v949_v49 = vadd.f32 %v948_v45, %v935_v44  ;;  %v975_v50 = vadd.f32 %v974_v43, %v961_v46 }
 0x102   :  { %v963_v51 = vadd.f32 %v962_v47, %v949_v49 }
 0x103   :  { %v988_v48 = vpop.f32.mrf.mxu3 }
 0x104   :  { %v989_v55 = vadd.f32 %v988_v48, %v975_v50 }
 0x107   :  { %v976_v52 = vpop.f32.mrf.mxu2 }
 0x108   :  { %v977_v57 = vadd.f32 %v976_v52, %v963_v51 }
 0x10b   :  { %v990_v59 = vpop.f32.mrf.mxu3 }
 0x10c   :  { %v991_v36 = vadd.f32 %v990_v59, %v977_v57 }
 0x117   :  { %v1002_v54 = vpop.f32.mrf.mxu0 }
 0x118   :  { %v1016_v56 = vpop.f32.mrf.mxu1  ;;  %v1003_v58 = vadd.f32 %v1002_v54, %v989_v55 }
 0x11a   :  { %v1017_v40 = vadd.f32 %v1016_v56, %v1003_v58 }
 0x11c   :  { %v1026_v0 = vmul.f32 0.2, %v1017_v40  ;;  %vm1022_vm2 = vcmp.gt.f32.partialorder %v1017_v40, 0.0 }
 0x11e   :  { %v1030_v3 = vsel %vm1022_vm2, %v1017_v40, %v1026_v0 }
 0x11f   :  { %v1004_v60 = vpop.f32.mrf.mxu0 }
 0x120   :  { %v1005_v62 = vadd.f32 %v1004_v60, %v991_v36  ;;  %v1018_v63 = vpop.f32.mrf.mxu1 }
 0x122   :  { %v1019_v1 = vadd.f32 %v1018_v63, %v1005_v62 }
 0x124   :  { %vm1024_vm3 = vcmp.gt.f32.partialorder %v1019_v1, 0.0  ;;  %v1028_v2 = vmul.f32 0.2, %v1019_v1 }
 0x126   :  { %v1032_v4 = vsel %vm1024_vm3, %v1019_v1, %v1028_v2 }
 0x127   :  { %v1034_v5 = vpack.c.bf16 %v1032_v4, %v1030_v3 }
 0x129   :  { %1189 = vmatmul.bf16.vlgmr.msrb.gmra.mxu3 %v1034_v5 }
 0x172   :  { %v1176_v15 = vpop.f32.mrf.mxu2 }
 0x173   :  { %v1177_v53 = vadd.f32 %v2034_v16, %v1176_v15 }
 0x17a   :  { %v1178_v18 = vpop.f32.mrf.mxu2 }
 0x17b   :  { %v1179_v21 = vadd.f32 %v2034_v16, %v1178_v18 }
 0x1ac   :  { %v1190_v17 = vpop.f32.mrf.mxu3 }
 0x1ad   :  { %v1191_v19 = vadd.f32 %v1190_v17, %v1177_v53 }
 0x1af   :  { %v1197_v23 = vmul.f32 0.2, %v1191_v19  ;;  %vm1195_vm4 = vcmp.gt.f32.partialorder %v1191_v19, 0.0 }
 0x1b1   :  { %v1199_v25 = vsel %vm1195_vm4, %v1191_v19, %v1197_v23 }
 0x1b4   :  { %v1192_v22 = vpop.f32.mrf.mxu3 }
 0x1b5   :  { %v1193_v24 = vadd.f32 %v1192_v22, %v1179_v21 }
 0x1b7   :  { %vm1196_vm5 = vcmp.gt.f32.partialorder %v1193_v24, 0.0  ;;  %v1198_v8 = vmul.f32 0.2, %v1193_v24 }
 0x1b9   :  { %v1200_v26 = vsel %vm1196_vm5, %v1193_v24, %v1198_v8 }
 0x1ba   :  { %v1201_v27 = vpack.c.bf16 %v1200_v26, %v1199_v25 }
 0x1bc   :  { %1278 = vmatmul.bf16.vlgmr.msra.gmra.mxu0 %v1201_v27 }
 0x239   :  { %v1279_v28 = vpop.f32.mrf.mxu0 }
 0x23a   :  { %v1280_v20 = vadd.f32 %v2035_v61, %v1279_v28 }
 0x23c   :  { %1284 = vst [vmem:[#allocation11] sm:$0xff] %v1280_v20 }
 0x241   :  { %v1281_v29 = vpop.f32.mrf.mxu0 }
 0x242   :  { %v1282_v30 = vadd.f32 %v2035_v61, %v1281_v29 }
 0x244   :  { %1285 = vst [vmem:[#allocation11 + $0x8] sm:$0xff] %v1282_v30 }
 0x245   :  { %1298 = dma.vmem_to_hbm [thread:$0]  %s1291_s8, 256, %s1293_s1, [#allocation4], %s2189_s9, %s2189_s9, %s2190_s10  }
 0x246   :  { %2186 = dma.done.wait [#allocation4], 256  }
 0x247   :  { %2187 = vsyncadd [#allocation4], 4294967040 }
 0x248   :  { %1303 = vsyncpa [#allocation3], 1 }
 0x249   :  { %1304 = vsyncpa [#allocation6], 1 }
 0x24a   :  { %1305 = vsyncpa [#allocation9], 1 }
 0x24b   :  { %1306 = vsyncpa [#allocation4], 1 }

</bundles_post_ra>
